<compile_context>
chip_gen: v6e
topology: v6e:2x2x1
jax: 0.10.0
libtpu: 0.0.40
codegen_flags: <defaults>
</compile_context>

<pallas_src>
import functools

import jax
import jax.numpy as jnp
from jax.experimental import pallas as pl
from jax.experimental.pallas import tpu as pltpu

EPS = 1e-5
NEG_SLOPE = 0.01  # nn.LeakyReLU() default


def _ru(x, m):
    return -(-x // m) * m


def _bottleneck_kernel(xcat_ref, w1_ref, w2_ref, m1_ref, m2_ref,
                       g1_ref, b1_ref, g2_ref, b2_ref, out_ref, *,
                       K, COUT, RIN, H, N, M2):
    """Fused Bottleneck forward (single program, everything lane-dense).

    xcat_ref : (N*RIN, K*W*Cin)  conv1 LHS with the K row taps pre-concatenated
                                 along lanes (wrapper-built), bf16.  Row
                                 r = n*RIN + PAD + h holds output position (n,h).
    w1_ref   : (K*W*Cin,  L)     row-expanded conv1 weights, bf16
    w2_ref   : (K*L,      L)     row-expanded conv2 weights, bf16
    m1_ref   : (N*RIN, L)        0/1 f32 mask of valid conv1 output rows
    m2_ref   : (M2,    L)        0/1 f32 mask of valid conv2 output rows
    g*/b*    : (1, L)            lane-tiled BN affine params, f32
    out_ref  : (N, H, L)         lane-dense output (L = W*Cout = 128), f32
    """
    L = out_ref.shape[-1]

    def leaky(v):
        return jnp.where(v > 0, v, NEG_SLOPE * v)

    def channel_fold(v):
        # lanes are laid out as w*COUT + c.  Exact f32 XLU lane fold: afterwards
        # every lane l holds the sum over w of channel (l % COUT).
        s = L // 2
        while s >= COUT:
            v = v + pltpu.roll(v, s, axis=1)
            s //= 2
        return v

    def bn_scale_shift(acc, mask, g_ref, b_ref):
        # Training-mode BN over (N, H, W) per channel, folded into one FMA.
        # Junk/halo rows contribute exactly 0 via the mask.
        inv_cnt = 1.0 / float(N * H * (L // COUT))
        am = acc * mask
        tot = jnp.sum(channel_fold(am), axis=0, keepdims=True)          # (1, L)
        totsq = jnp.sum(channel_fold(am * acc), axis=0, keepdims=True)  # (1, L)
        mu = tot * inv_cnt
        var = jnp.maximum(totsq * inv_cnt - mu * mu, 0.0)   # cancellation guard
        scale = g_ref[...] * jax.lax.rsqrt(var + EPS)
        shift = b_ref[...] - mu * scale
        return scale, shift

    # ---- conv1: one deep batched matmul (LHS pre-concatenated in wrapper) ----
    acc1 = jnp.dot(xcat_ref[...], w1_ref[...],
                   preferred_element_type=jnp.float32)        # (N*RIN, L) f32

    m1 = m1_ref[...]
    s1, t1 = bn_scale_shift(acc1, m1, g1_ref, b1_ref)
    # Masked activation == padded conv2 input slab (halo rows exactly zero).
    h1 = m1 * leaky(acc1 * s1 + t1)                           # (N*RIN, L) f32

    # ---- conv2: K row taps folded into the contraction (one relayout + cast) -
    lhs2 = jnp.concatenate([h1[kh:kh + M2, :] for kh in range(K)],
                           axis=1).astype(jnp.bfloat16)       # (M2, K*L) bf16
    acc2 = jnp.dot(lhs2, w2_ref[...],
                   preferred_element_type=jnp.float32)        # (M2, L) f32

    s2, t2 = bn_scale_shift(acc2, m2_ref[...], g2_ref, b2_ref)
    y = leaky(acc2 * s2 + t2)                                 # (M2, L) f32

    # ---- lane-dense, (8,128)-aligned output stores (RIN, H multiples of 8) ---
    for n in range(N):
        out_ref[n] = y[n * RIN:n * RIN + H, :]


def _expand_conv_weights(wt, W, K, PAD):
    """torch OIHW conv weight -> (K*W*Cin, W*Cout) row-expanded matrix folding
    the (kh, kw, ci) contraction and the width 'same' padding:

      M[kh*W*Cin + w_in*Cin + ci, w*Cout + co] = wt[co, ci, kh, w_in - w + PAD]
                                                 if 0 <= w_in - w + PAD < K else 0
    """
    rows = []
    for kh in range(K):
        r = None
        for kw in range(K):
            term = jnp.kron(jnp.eye(W, k=PAD - kw, dtype=jnp.float32),
                            wt[:, :, kh, kw].T.astype(jnp.float32))
            r = term if r is None else r + term
        rows.append(r)
    return jnp.concatenate(rows, axis=0)           # (K*W*Cin, W*Cout) f32


def prepare_bottleneck_params(w1, g1, b1, w2, g2, b2, *, x_shape, kernel_size):
    """Parameter-only layout work, hoisted off the per-call hot path."""
    K = kernel_size
    PAD = (K - 1) // 2
    N, Cin, H, W = x_shape
    Cout = w1.shape[0]
    L = W * Cout
    assert W & (W - 1) == 0 and Cout & (Cout - 1) == 0, \
        "channel lane-fold assumes W and Cout are powers of two"
    RIN = _ru(H + 2 * PAD, 8)                 # per-image padded slab rows
    SROWS = N * RIN
    M2 = (N - 1) * RIN + _ru(H, 8)            # conv2 output rows (junk tail dropped)
    assert M2 + K - 1 <= SROWS

    w1cat = _expand_conv_weights(w1, W, K, PAD).astype(jnp.bfloat16)  # (K*W*Cin, L)
    w2cat = _expand_conv_weights(w2, W, K, PAD).astype(jnp.bfloat16)  # (K*L,     L)
    g1l = jnp.tile(g1.astype(jnp.float32), W).reshape(1, L)
    b1l = jnp.tile(b1.astype(jnp.float32), W).reshape(1, L)
    g2l = jnp.tile(g2.astype(jnp.float32), W).reshape(1, L)
    b2l = jnp.tile(b2.astype(jnp.float32), W).reshape(1, L)

    # 0/1 row masks: valid conv1 output rows sit at padded offset PAD inside each
    # per-image RIN-row slab; valid conv2 output rows sit at offset 0.
    r1 = jnp.arange(SROWS) % RIN
    mask1 = jnp.broadcast_to(((r1 >= PAD) & (r1 < PAD + H))[:, None],
                             (SROWS, L)).astype(jnp.float32)
    r2 = jnp.arange(M2) % RIN
    mask2 = jnp.broadcast_to((r2 < H)[:, None], (M2, L)).astype(jnp.float32)
    return (w1cat, w2cat, g1l, b1l, g2l, b2l, mask1, mask2)


def bottleneck_pallas(x_nchw, params, *, kernel_size):
    """Wrapper: NCHW in / NCHW out, same semantics as the PyTorch module."""
    K = kernel_size
    PAD = (K - 1) // 2
    N, Cin, H, W = x_nchw.shape
    w1cat, w2cat, g1l, b1l, g2l, b2l, mask1, mask2 = params
    L = g1l.shape[-1]
    Cout = L // W
    RIN = _ru(H + 2 * PAD, 8)
    SROWS = N * RIN
    M2 = mask2.shape[0]

    # ---- per-call layout glue (no compute): NCHW -> padded slabs -> conv1 LHS -
    x2d = jnp.transpose(x_nchw, (0, 2, 3, 1)).reshape(N, H, W * Cin)
    xflat = jnp.pad(x2d, ((0, 0), (PAD, RIN - H - PAD), (0, 0))).reshape(SROWS, W * Cin)
    canvas = jnp.pad(xflat, ((PAD, PAD), (0, 0)))
    # row r = n*RIN + PAD + h of xcat holds concat_kh(padded input row r-PAD+kh)
    xcat = jnp.concatenate([canvas[kh:kh + SROWS] for kh in range(K)],
                           axis=1).astype(jnp.bfloat16)       # (SROWS, K*W*Cin)

    flops = 2 * SROWS * (K * W * Cin) * L + 2 * M2 * (K * L) * L
    bytes_accessed = (xcat.size * 2 + w1cat.size * 2 + w2cat.size * 2
                      + (mask1.size + mask2.size + 4 * L) * 4 + N * H * L * 4)

    kern = functools.partial(_bottleneck_kernel, K=K, COUT=Cout, RIN=RIN,
                             H=H, N=N, M2=M2)
    out2d = pl.pallas_call(
        kern,
        out_shape=jax.ShapeDtypeStruct((N, H, L), jnp.float32),
        grid=(1,),
        in_specs=[
            pl.BlockSpec((SROWS, K * W * Cin), lambda i: (0, 0)),
            pl.BlockSpec((K * W * Cin, L), lambda i: (0, 0)),
            pl.BlockSpec((K * L, L), lambda i: (0, 0)),
            pl.BlockSpec((SROWS, L), lambda i: (0, 0)),
            pl.BlockSpec((M2, L), lambda i: (0, 0)),
            pl.BlockSpec((1, L), lambda i: (0, 0)),
            pl.BlockSpec((1, L), lambda i: (0, 0)),
            pl.BlockSpec((1, L), lambda i: (0, 0)),
            pl.BlockSpec((1, L), lambda i: (0, 0)),
        ],
        out_specs=pl.BlockSpec((N, H, L), lambda i: (0, 0, 0)),
        compiler_params=pltpu.CompilerParams(
            dimension_semantics=("arbitrary",),
            vmem_limit_bytes=8 * 1024 * 1024),
        cost_estimate=pl.CostEstimate(flops=flops, transcendentals=2 * L,
                                      bytes_accessed=bytes_accessed),
    )(xcat, w1cat, w2cat, mask1, mask2, g1l, b1l, g2l, b2l)

    # lane-dense (N, H, W*Cout) -> NCHW (pure layout glue)
    return jnp.transpose(out2d.reshape(N, H, W, Cout), (0, 3, 1, 2))


# ----------------------- pure-JAX reference (for verification) ---------------
def bottleneck_ref(x_nchw, w1, g1, b1, w2, g2, b2, *, matmul_dtype=jnp.float32):
    prec = jax.lax.Precision.HIGHEST if matmul_dtype == jnp.float32 else None

    def conv(h, w):
        return jax.lax.conv_general_dilated(
            h.astype(matmul_dtype), w.astype(matmul_dtype),
            window_strides=(1, 1), padding="SAME",
            dimension_numbers=("NCHW", "OIHW", "NCHW"),
            preferred_element_type=jnp.float32, precision=prec)

    def bn(h, g, b):
        mu = jnp.mean(h, axis=(0, 2, 3), keepdims=True)
        var = jnp.mean((h - mu) ** 2, axis=(0, 2, 3), keepdims=True)
        return ((h - mu) * jax.lax.rsqrt(var + EPS)
                * g.reshape(1, -1, 1, 1) + b.reshape(1, -1, 1, 1))

    def leaky(h):
        return jnp.where(h > 0, h, NEG_SLOPE * h)

    h = leaky(bn(conv(x_nchw, w1), g1, b1))
    h = leaky(bn(conv(h, w2), g2, b2))
    return h


if __name__ == "__main__":
    # Bottleneck(4, 8, 3) on a (2, 4, 16, 16) input.
    N, Cin, Cout, H, W, K = 2, 4, 8, 16, 16, 3

    key = jax.random.PRNGKey(0)
    kx, kw1, kw2 = jax.random.split(key, 3)

    x = jax.random.normal(kx, (N, Cin, H, W), jnp.float32)
    # Deterministic synthetic weights (fan-in scaled), torch layout (O, I, K, K)
    w1 = jax.random.normal(kw1, (Cout, Cin, K, K), jnp.float32) / (Cin * K * K) ** 0.5
    w2 = jax.random.normal(kw2, (Cout, Cout, K, K), jnp.float32) / (Cout * K * K) ** 0.5
    # BatchNorm2d default affine params: gamma=1, beta=0
    g1 = jnp.ones((Cout,), jnp.float32)
    b1 = jnp.zeros((Cout,), jnp.float32)
    g2 = jnp.ones((Cout,), jnp.float32)
    b2 = jnp.zeros((Cout,), jnp.float32)

    # Parameter-only layout work done once, off the per-call hot path.
    params = prepare_bottleneck_params(w1, g1, b1, w2, g2, b2,
                                       x_shape=x.shape, kernel_size=K)
    params = tuple(jax.block_until_ready(p) for p in params)

    fwd = jax.jit(functools.partial(bottleneck_pallas, kernel_size=K))
    out = jax.block_until_ready(fwd(x, params))
    assert out.shape == (N, Cout, H, W), out.shape

    # Tight logic check against a matched-precision reference (bf16 MXU operands,
    # f32 accumulation and f32 BN) -- isolates kernel correctness from dtype.
    ref_bf16 = bottleneck_ref(x, w1, g1, b1, w2, g2, b2,
                              matmul_dtype=jnp.bfloat16)
    err_b = float(jnp.max(jnp.abs(out - ref_bf16)))
    assert jnp.allclose(out, ref_bf16, rtol=1e-2, atol=1e-2), err_b

    # Semantics check against the full-f32 reference; tolerance reflects the
    # intentional bf16 MXU operands (per perf guidance), BN math stays f32.
    ref_f32 = bottleneck_ref(x, w1, g1, b1, w2, g2, b2,
                             matmul_dtype=jnp.float32)
    err_f = float(jnp.max(jnp.abs(out - ref_f32)))
    assert jnp.allclose(out, ref_f32, rtol=5e-2, atol=5e-2), err_f

    print("KERNEL_OK")
</pallas_src>

<mosaic_0001>
module attributes {stable_mosaic.version = 11 : i64} {
  func.func @_bottleneck_kernel(%arg0: i32, %arg1: memref<48x192xbf16, #tpu.memory_space<vmem>>, %arg2: memref<192x128xbf16, #tpu.memory_space<vmem>>, %arg3: memref<384x128xbf16, #tpu.memory_space<vmem>>, %arg4: memref<48x128xf32, #tpu.memory_space<vmem>>, %arg5: memref<40x128xf32, #tpu.memory_space<vmem>>, %arg6: memref<1x128xf32, #tpu.memory_space<vmem>>, %arg7: memref<1x128xf32, #tpu.memory_space<vmem>>, %arg8: memref<1x128xf32, #tpu.memory_space<vmem>>, %arg9: memref<1x128xf32, #tpu.memory_space<vmem>>, %arg10: memref<2x16x128xf32, #tpu.memory_space<vmem>>) attributes {dimension_semantics = [#tpu.dimension_semantics<arbitrary>], iteration_bounds = array<i64: 1>, scalar_prefetch = 0 : i64, scratch_operands = 0 : i64, tpu.core_type = #tpu.core_type<tc>, window_params = [{pipeline_mode = #tpu.pipeline_mode<synchronous>, transform_indices = @transform_0, window_bounds = array<i64: 48, 192>}, {pipeline_mode = #tpu.pipeline_mode<synchronous>, transform_indices = @transform_1, window_bounds = array<i64: 192, 128>}, {pipeline_mode = #tpu.pipeline_mode<synchronous>, transform_indices = @transform_2, window_bounds = array<i64: 384, 128>}, {pipeline_mode = #tpu.pipeline_mode<synchronous>, transform_indices = @transform_3, window_bounds = array<i64: 48, 128>}, {pipeline_mode = #tpu.pipeline_mode<synchronous>, transform_indices = @transform_4, window_bounds = array<i64: 40, 128>}, {pipeline_mode = #tpu.pipeline_mode<synchronous>, transform_indices = @transform_5, window_bounds = array<i64: 1, 128>}, {pipeline_mode = #tpu.pipeline_mode<synchronous>, transform_indices = @transform_6, window_bounds = array<i64: 1, 128>}, {pipeline_mode = #tpu.pipeline_mode<synchronous>, transform_indices = @transform_7, window_bounds = array<i64: 1, 128>}, {pipeline_mode = #tpu.pipeline_mode<synchronous>, transform_indices = @transform_8, window_bounds = array<i64: 1, 128>}, {pipeline_mode = #tpu.pipeline_mode<synchronous>, transform_indices = @transform_9, window_bounds = array<i64: 2, 16, 128>}]} {
    %c0 = arith.constant 0 : index
    %c0_0 = arith.constant 0 : index
    %0 = vector.load %arg1[%c0, %c0_0] : memref<48x192xbf16, #tpu.memory_space<vmem>>, vector<48x192xbf16>
    %c0_1 = arith.constant 0 : index
    %c0_2 = arith.constant 0 : index
    %1 = vector.load %arg2[%c0_1, %c0_2] : memref<192x128xbf16, #tpu.memory_space<vmem>>, vector<192x128xbf16>
    %cst = arith.constant dense<0.000000e+00> : vector<48x128xf32>
    %2 = tpu.matmul %0, %1, %cst {dimension_numbers = #tpu.dot_dimension_numbers<[1], [0], [0], [1], [0, 0, 1, 1], [], []>} : vector<48x192xbf16>, vector<192x128xbf16>, vector<48x128xf32> -> vector<48x128xf32>
    %c0_3 = arith.constant 0 : index
    %c0_4 = arith.constant 0 : index
    %3 = vector.load %arg4[%c0_3, %c0_4] : memref<48x128xf32, #tpu.memory_space<vmem>>, vector<48x128xf32>
    %4 = arith.mulf %2, %3 : vector<48x128xf32>
    %c64_i32 = arith.constant 64 : i32
    %5 = tpu.dynamic_rotate %4 by %c64_i32 dim 1 : vector<48x128xf32>, i32 -> vector<48x128xf32>
    %6 = arith.addf %4, %5 : vector<48x128xf32>
    %c32_i32 = arith.constant 32 : i32
    %7 = tpu.dynamic_rotate %6 by %c32_i32 dim 1 : vector<48x128xf32>, i32 -> vector<48x128xf32>
    %8 = arith.addf %6, %7 : vector<48x128xf32>
    %c16_i32 = arith.constant 16 : i32
    %9 = tpu.dynamic_rotate %8 by %c16_i32 dim 1 : vector<48x128xf32>, i32 -> vector<48x128xf32>
    %10 = arith.addf %8, %9 : vector<48x128xf32>
    %c8_i32 = arith.constant 8 : i32
    %11 = tpu.dynamic_rotate %10 by %c8_i32 dim 1 : vector<48x128xf32>, i32 -> vector<48x128xf32>
    %12 = arith.addf %10, %11 : vector<48x128xf32>
    %cst_5 = arith.constant dense<0.000000e+00> : vector<128xf32>
    %13 = vector.multi_reduction <add>, %12, %cst_5 [0] : vector<48x128xf32> to vector<128xf32>
    %14 = vector.shape_cast %13 : vector<128xf32> to vector<1x128xf32>
    %15 = arith.mulf %4, %2 : vector<48x128xf32>
    %c64_i32_6 = arith.constant 64 : i32
    %16 = tpu.dynamic_rotate %15 by %c64_i32_6 dim 1 : vector<48x128xf32>, i32 -> vector<48x128xf32>
    %17 = arith.addf %15, %16 : vector<48x128xf32>
    %c32_i32_7 = arith.constant 32 : i32
    %18 = tpu.dynamic_rotate %17 by %c32_i32_7 dim 1 : vector<48x128xf32>, i32 -> vector<48x128xf32>
    %19 = arith.addf %17, %18 : vector<48x128xf32>
    %c16_i32_8 = arith.constant 16 : i32
    %20 = tpu.dynamic_rotate %19 by %c16_i32_8 dim 1 : vector<48x128xf32>, i32 -> vector<48x128xf32>
    %21 = arith.addf %19, %20 : vector<48x128xf32>
    %c8_i32_9 = arith.constant 8 : i32
    %22 = tpu.dynamic_rotate %21 by %c8_i32_9 dim 1 : vector<48x128xf32>, i32 -> vector<48x128xf32>
    %23 = arith.addf %21, %22 : vector<48x128xf32>
    %cst_10 = arith.constant dense<0.000000e+00> : vector<128xf32>
    %24 = vector.multi_reduction <add>, %23, %cst_10 [0] : vector<48x128xf32> to vector<128xf32>
    %25 = vector.shape_cast %24 : vector<128xf32> to vector<1x128xf32>
    %cst_11 = arith.constant 0.001953125 : f32
    %26 = vector.broadcast %cst_11 : f32 to vector<1x128xf32>
    %27 = arith.mulf %14, %26 : vector<1x128xf32>
    %cst_12 = arith.constant 0.001953125 : f32
    %28 = vector.broadcast %cst_12 : f32 to vector<1x128xf32>
    %29 = arith.mulf %25, %28 : vector<1x128xf32>
    %30 = arith.mulf %27, %27 : vector<1x128xf32>
    %31 = arith.subf %29, %30 : vector<1x128xf32>
    %cst_13 = arith.constant 0.000000e+00 : f32
    %32 = vector.broadcast %cst_13 : f32 to vector<1x128xf32>
    %33 = arith.maximumf %31, %32 : vector<1x128xf32>
    %c0_14 = arith.constant 0 : index
    %c0_15 = arith.constant 0 : index
    %34 = vector.load %arg6[%c0_14, %c0_15] : memref<1x128xf32, #tpu.memory_space<vmem>>, vector<1x128xf32>
    %cst_16 = arith.constant 9.99999974E-6 : f32
    %35 = vector.broadcast %cst_16 : f32 to vector<1x128xf32>
    %36 = arith.addf %33, %35 : vector<1x128xf32>
    %37 = math.rsqrt %36 : vector<1x128xf32>
    %38 = arith.mulf %34, %37 : vector<1x128xf32>
    %c0_17 = arith.constant 0 : index
    %c0_18 = arith.constant 0 : index
    %39 = vector.load %arg7[%c0_17, %c0_18] : memref<1x128xf32, #tpu.memory_space<vmem>>, vector<1x128xf32>
    %40 = arith.mulf %27, %38 : vector<1x128xf32>
    %41 = arith.subf %39, %40 : vector<1x128xf32>
    %42 = vector.broadcast %38 : vector<1x128xf32> to vector<48x128xf32>
    %43 = arith.mulf %2, %42 : vector<48x128xf32>
    %44 = vector.broadcast %41 : vector<1x128xf32> to vector<48x128xf32>
    %45 = arith.addf %43, %44 : vector<48x128xf32>
    %cst_19 = arith.constant 0.000000e+00 : f32
    %46 = vector.broadcast %cst_19 : f32 to vector<48x128xf32>
    %47 = arith.cmpf ogt, %45, %46 : vector<48x128xf32>
    %cst_20 = arith.constant 0.00999999977 : f32
    %48 = vector.broadcast %cst_20 : f32 to vector<48x128xf32>
    %49 = arith.mulf %48, %45 : vector<48x128xf32>
    %50 = arith.select %47, %45, %49 : vector<48x128xi1>, vector<48x128xf32>
    %51 = arith.mulf %3, %50 : vector<48x128xf32>
    %52 = vector.extract_strided_slice %51 {offsets = [0, 0], sizes = [40, 128], strides = [1, 1]} : vector<48x128xf32> to vector<40x128xf32>
    %53 = vector.extract_strided_slice %51 {offsets = [1, 0], sizes = [40, 128], strides = [1, 1]} : vector<48x128xf32> to vector<40x128xf32>
    %54 = vector.extract_strided_slice %51 {offsets = [2, 0], sizes = [40, 128], strides = [1, 1]} : vector<48x128xf32> to vector<40x128xf32>
    %55 = tpu.concatenate %52, %53, %54 in 1 : vector<40x128xf32>, vector<40x128xf32>, vector<40x128xf32> -> vector<40x384xf32>
    %56 = arith.truncf %55 : vector<40x384xf32> to vector<40x384xbf16>
    %c0_21 = arith.constant 0 : index
    %c0_22 = arith.constant 0 : index
    %57 = vector.load %arg3[%c0_21, %c0_22] : memref<384x128xbf16, #tpu.memory_space<vmem>>, vector<384x128xbf16>
    %cst_23 = arith.constant dense<0.000000e+00> : vector<40x128xf32>
    %58 = tpu.matmul %56, %57, %cst_23 {dimension_numbers = #tpu.dot_dimension_numbers<[1], [0], [0], [1], [0, 0, 1, 1], [], []>} : vector<40x384xbf16>, vector<384x128xbf16>, vector<40x128xf32> -> vector<40x128xf32>
    %c0_24 = arith.constant 0 : index
    %c0_25 = arith.constant 0 : index
    %59 = vector.load %arg5[%c0_24, %c0_25] : memref<40x128xf32, #tpu.memory_space<vmem>>, vector<40x128xf32>
    %60 = arith.mulf %58, %59 : vector<40x128xf32>
    %c64_i32_26 = arith.constant 64 : i32
    %61 = tpu.dynamic_rotate %60 by %c64_i32_26 dim 1 : vector<40x128xf32>, i32 -> vector<40x128xf32>
    %62 = arith.addf %60, %61 : vector<40x128xf32>
    %c32_i32_27 = arith.constant 32 : i32
    %63 = tpu.dynamic_rotate %62 by %c32_i32_27 dim 1 : vector<40x128xf32>, i32 -> vector<40x128xf32>
    %64 = arith.addf %62, %63 : vector<40x128xf32>
    %c16_i32_28 = arith.constant 16 : i32
    %65 = tpu.dynamic_rotate %64 by %c16_i32_28 dim 1 : vector<40x128xf32>, i32 -> vector<40x128xf32>
    %66 = arith.addf %64, %65 : vector<40x128xf32>
    %c8_i32_29 = arith.constant 8 : i32
    %67 = tpu.dynamic_rotate %66 by %c8_i32_29 dim 1 : vector<40x128xf32>, i32 -> vector<40x128xf32>
    %68 = arith.addf %66, %67 : vector<40x128xf32>
    %cst_30 = arith.constant dense<0.000000e+00> : vector<128xf32>
    %69 = vector.multi_reduction <add>, %68, %cst_30 [0] : vector<40x128xf32> to vector<128xf32>
    %70 = vector.shape_cast %69 : vector<128xf32> to vector<1x128xf32>
    %71 = arith.mulf %60, %58 : vector<40x128xf32>
    %c64_i32_31 = arith.constant 64 : i32
    %72 = tpu.dynamic_rotate %71 by %c64_i32_31 dim 1 : vector<40x128xf32>, i32 -> vector<40x128xf32>
    %73 = arith.addf %71, %72 : vector<40x128xf32>
    %c32_i32_32 = arith.constant 32 : i32
    %74 = tpu.dynamic_rotate %73 by %c32_i32_32 dim 1 : vector<40x128xf32>, i32 -> vector<40x128xf32>
    %75 = arith.addf %73, %74 : vector<40x128xf32>
    %c16_i32_33 = arith.constant 16 : i32
    %76 = tpu.dynamic_rotate %75 by %c16_i32_33 dim 1 : vector<40x128xf32>, i32 -> vector<40x128xf32>
    %77 = arith.addf %75, %76 : vector<40x128xf32>
    %c8_i32_34 = arith.constant 8 : i32
    %78 = tpu.dynamic_rotate %77 by %c8_i32_34 dim 1 : vector<40x128xf32>, i32 -> vector<40x128xf32>
    %79 = arith.addf %77, %78 : vector<40x128xf32>
    %cst_35 = arith.constant dense<0.000000e+00> : vector<128xf32>
    %80 = vector.multi_reduction <add>, %79, %cst_35 [0] : vector<40x128xf32> to vector<128xf32>
    %81 = vector.shape_cast %80 : vector<128xf32> to vector<1x128xf32>
    %cst_36 = arith.constant 0.001953125 : f32
    %82 = vector.broadcast %cst_36 : f32 to vector<1x128xf32>
    %83 = arith.mulf %70, %82 : vector<1x128xf32>
    %cst_37 = arith.constant 0.001953125 : f32
    %84 = vector.broadcast %cst_37 : f32 to vector<1x128xf32>
    %85 = arith.mulf %81, %84 : vector<1x128xf32>
    %86 = arith.mulf %83, %83 : vector<1x128xf32>
    %87 = arith.subf %85, %86 : vector<1x128xf32>
    %cst_38 = arith.constant 0.000000e+00 : f32
    %88 = vector.broadcast %cst_38 : f32 to vector<1x128xf32>
    %89 = arith.maximumf %87, %88 : vector<1x128xf32>
    %c0_39 = arith.constant 0 : index
    %c0_40 = arith.constant 0 : index
    %90 = vector.load %arg8[%c0_39, %c0_40] : memref<1x128xf32, #tpu.memory_space<vmem>>, vector<1x128xf32>
    %cst_41 = arith.constant 9.99999974E-6 : f32
    %91 = vector.broadcast %cst_41 : f32 to vector<1x128xf32>
    %92 = arith.addf %89, %91 : vector<1x128xf32>
    %93 = math.rsqrt %92 : vector<1x128xf32>
    %94 = arith.mulf %90, %93 : vector<1x128xf32>
    %c0_42 = arith.constant 0 : index
    %c0_43 = arith.constant 0 : index
    %95 = vector.load %arg9[%c0_42, %c0_43] : memref<1x128xf32, #tpu.memory_space<vmem>>, vector<1x128xf32>
    %96 = arith.mulf %83, %94 : vector<1x128xf32>
    %97 = arith.subf %95, %96 : vector<1x128xf32>
    %98 = vector.broadcast %94 : vector<1x128xf32> to vector<40x128xf32>
    %99 = arith.mulf %58, %98 : vector<40x128xf32>
    %100 = vector.broadcast %97 : vector<1x128xf32> to vector<40x128xf32>
    %101 = arith.addf %99, %100 : vector<40x128xf32>
    %cst_44 = arith.constant 0.000000e+00 : f32
    %102 = vector.broadcast %cst_44 : f32 to vector<40x128xf32>
    %103 = arith.cmpf ogt, %101, %102 : vector<40x128xf32>
    %cst_45 = arith.constant 0.00999999977 : f32
    %104 = vector.broadcast %cst_45 : f32 to vector<40x128xf32>
    %105 = arith.mulf %104, %101 : vector<40x128xf32>
    %106 = arith.select %103, %101, %105 : vector<40x128xi1>, vector<40x128xf32>
    %107 = vector.extract_strided_slice %106 {offsets = [0, 0], sizes = [16, 128], strides = [1, 1]} : vector<40x128xf32> to vector<16x128xf32>
    %c0_46 = arith.constant 0 : index
    %c0_47 = arith.constant 0 : index
    %c0_48 = arith.constant 0 : index
    %108 = vector.load %arg10[%c0_46, %c0_47, %c0_48] : memref<2x16x128xf32, #tpu.memory_space<vmem>>, vector<1x16x128xf32>
    %109 = vector.shape_cast %108 : vector<1x16x128xf32> to vector<16x128xf32>
    %110 = vector.shape_cast %107 : vector<16x128xf32> to vector<1x16x128xf32>
    tpu.vector_store %arg10[%c0_46, %c0_47, %c0_48], %110 {strides = array<i32>} : memref<2x16x128xf32, #tpu.memory_space<vmem>>, vector<1x16x128xf32>,
    %111 = vector.extract_strided_slice %106 {offsets = [24, 0], sizes = [16, 128], strides = [1, 1]} : vector<40x128xf32> to vector<16x128xf32>
    %c1 = arith.constant 1 : index
    %c0_49 = arith.constant 0 : index
    %c0_50 = arith.constant 0 : index
    %112 = vector.load %arg10[%c1, %c0_49, %c0_50] : memref<2x16x128xf32, #tpu.memory_space<vmem>>, vector<1x16x128xf32>
    %113 = vector.shape_cast %112 : vector<1x16x128xf32> to vector<16x128xf32>
    %114 = vector.shape_cast %111 : vector<16x128xf32> to vector<1x16x128xf32>
    tpu.vector_store %arg10[%c1, %c0_49, %c0_50], %114 {strides = array<i32>} : memref<2x16x128xf32, #tpu.memory_space<vmem>>, vector<1x16x128xf32>,
    return
  }
  func.func @transform_0(%arg0: i32) -> (i32, i32) {
    %c0_i32 = arith.constant 0 : i32
    %c0_i32_0 = arith.constant 0 : i32
    %c0_i32_1 = arith.constant 0 : i32
    return %c0_i32, %c0_i32_0 : i32, i32
  }
  func.func @transform_1(%arg0: i32) -> (i32, i32) {
    %c0_i32 = arith.constant 0 : i32
    %c0_i32_0 = arith.constant 0 : i32
    %c0_i32_1 = arith.constant 0 : i32
    return %c0_i32, %c0_i32_0 : i32, i32
  }
  func.func @transform_2(%arg0: i32) -> (i32, i32) {
    %c0_i32 = arith.constant 0 : i32
    %c0_i32_0 = arith.constant 0 : i32
    %c0_i32_1 = arith.constant 0 : i32
    return %c0_i32, %c0_i32_0 : i32, i32
  }
  func.func @transform_3(%arg0: i32) -> (i32, i32) {
    %c0_i32 = arith.constant 0 : i32
    %c0_i32_0 = arith.constant 0 : i32
    %c0_i32_1 = arith.constant 0 : i32
    return %c0_i32, %c0_i32_0 : i32, i32
  }
  func.func @transform_4(%arg0: i32) -> (i32, i32) {
    %c0_i32 = arith.constant 0 : i32
    %c0_i32_0 = arith.constant 0 : i32
    %c0_i32_1 = arith.constant 0 : i32
    return %c0_i32, %c0_i32_0 : i32, i32
  }
  func.func @transform_5(%arg0: i32) -> (i32, i32) {
    %c0_i32 = arith.constant 0 : i32
    %c0_i32_0 = arith.constant 0 : i32
    %c0_i32_1 = arith.constant 0 : i32
    return %c0_i32, %c0_i32_0 : i32, i32
  }
  func.func @transform_6(%arg0: i32) -> (i32, i32) {
    %c0_i32 = arith.constant 0 : i32
    %c0_i32_0 = arith.constant 0 : i32
    %c0_i32_1 = arith.constant 0 : i32
    return %c0_i32, %c0_i32_0 : i32, i32
  }
  func.func @transform_7(%arg0: i32) -> (i32, i32) {
    %c0_i32 = arith.constant 0 : i32
    %c0_i32_0 = arith.constant 0 : i32
    %c0_i32_1 = arith.constant 0 : i32
    return %c0_i32, %c0_i32_0 : i32, i32
  }
  func.func @transform_8(%arg0: i32) -> (i32, i32) {
    %c0_i32 = arith.constant 0 : i32
    %c0_i32_0 = arith.constant 0 : i32
    %c0_i32_1 = arith.constant 0 : i32
    return %c0_i32, %c0_i32_0 : i32, i32
  }
  func.func @transform_9(%arg0: i32) -> (i32, i32, i32) {
    %c0_i32 = arith.constant 0 : i32
    %c0_i32_0 = arith.constant 0 : i32
    %c0_i32_1 = arith.constant 0 : i32
    %c0_i32_2 = arith.constant 0 : i32
    return %c0_i32, %c0_i32_0, %c0_i32_1 : i32, i32, i32
  }
}

</mosaic_0001>

<bundles_post_ra>
// kernel: bottleneck_pallas.1
= control target key start
LH: loop header
LB: loop body
LE: loop exit
PB: predicated region body
PF: predicated region fallthrough
CT: control target
= control target key end

     0   :  { %v1210_v0 = vmov 0   ;;  %vm162_vm0 = vcmask 523264   ;;  %s1211_s27 = smov 64   ;;  %s1213_s14 = smov 16   ;;  %vm479_vm6 = vcmask 1046528   ;;  %vm1216_vm8 = vmmov 0   ;;  %s1719_s1 = inlined_call_operand.vmem [shape: bf16[192,128], index: 1, kind: input, shape index: {}]   ;;  %s1720_s0 = inlined_call_operand.vmem [shape: bf16[48,192], index: 0, kind: input, shape index: {}]   ;;  %s1721_s3 = inlined_call_operand.vmem [shape: f32[48,128], index: 3, kind: input, shape index: {}]   ;;  %s1722_s2 = inlined_call_operand.vmem [shape: bf16[384,128], index: 2, kind: input, shape index: {}]   ;;  %s1723_s5 = inlined_call_operand.vmem [shape: f32[1,128], index: 5, kind: input, shape index: {}]   ;;  %s1724_s6 = inlined_call_operand.vmem [shape: f32[1,128], index: 6, kind: input, shape index: {}]   ;;  %s1725_s4 = inlined_call_operand.vmem [shape: f32[40,128], index: 4, kind: input, shape index: {}]   ;;  %s1726_s7 = inlined_call_operand.vmem [shape: f32[1,128], index: 7, kind: input, shape index: {}]   ;;  %s1727_s8 = inlined_call_operand.vmem [shape: f32[1,128], index: 8, kind: input, shape index: {}]   ;;  %s1728_s9 = inlined_call_operand.vmem [shape: f32[2,16,128], index: 9, kind: output, shape index: {}]  }
   0x1   :  { %172 = vmatprep.subr.bf16.mxu0 %v1210_v0  ;;  %v1161_v1 = vld [vmem:[%s1719_s1 + $0x38] sm:$0xff]   ;;  %v1162_v2 = vld [vmem:[%s1719_s1 + $0x30] sm:$0xff]   ;;  %v1163_v3 = vld [vmem:[%s1719_s1 + $0x28] sm:$0xff]   ;;  %s1214_s15 = smov 8   ;;  %vm496_vm9 = vcmask 1045504  }
   0x2   :  { %173 = vmatpush1.bf16.msra.mxu0 %v1161_v1  ;;  %v1164_v4 = vld [vmem:[%s1719_s1 + $0x20] sm:$0xff]   ;;  %v1165_v6 = vld [vmem:[%s1719_s1 + $0x18] sm:$0xff]   ;;  %v1166_v7 = vld [vmem:[%s1719_s1 + $0x10] sm:$0xff]  }
   0x3   :  { %174 = vmatprep.subr.bf16.mxu0 %v1210_v0  ;;  %v1175_v5 = vld [vmem:[%s1720_s0 + $0x4] ss:$8 sps:$4 sm:$0xff]   ;;  %v1169_v10 = vld [vmem:[%s1719_s1 + $0x58] sm:$0xff]   ;;  %v1170_v11 = vld [vmem:[%s1719_s1 + $0x50] sm:$0xff]  }
   0x4   :  { %1052 = vmatprep.mubr.msk.bf16.mxu0 %vm162_vm0, %v1175_v5  ;;  %v1167_v8 = vld [vmem:[%s1719_s1 + $0x8] sm:$0xff]   ;;  %v1168_v9 = vld [vmem:[%s1719_s1] sm:$0xff]   ;;  %v1176_v15 = vld [vmem:[%s1720_s0 + $0x14] ss:$8 sps:$4 sm:$0xff]  }
   0x5   :  { %v1171_v12 = vld [vmem:[%s1719_s1 + $0x48] sm:$0xff]   ;;  %v1172_v13 = vld [vmem:[%s1719_s1 + $0x40] sm:$0xff]   ;;  %v1178_v16 = vld [vmem:[%s1720_s0 + $0x10] ss:$8 sps:$4 sm:$0xff]  }
   0x6   :  { %175 = vmatpush1.bf16.msra.mxu0 %v1162_v2  ;;  %v1173_v14 = vld [vmem:[%s1720_s0] ss:$8 sps:$4 sm:$0xff]   ;;  %v1179_v17 = vld [vmem:[%s1720_s0 + $0x24] ss:$8 sps:$4 sm:$0xff]   ;;  %v1348_v28 = vld [vmem:[%s1721_s3 + $0x10] sm:$0xff] }
   0x7   :  { %176 = vmatprep.subr.bf16.mxu0 %v1210_v0  ;;  %v1181_v18 = vld [vmem:[%s1720_s0 + $0x20] ss:$8 sps:$4 sm:$0xff]   ;;  %v1359_v33 = vld [vmem:[%s1721_s3 + $0x18] sm:$0xff] }
   0x8   :  { %v1327_v19 = vld [vmem:[%s1721_s3] sm:$0xff]  ;;  %v1336_v23 = vld [vmem:[%s1721_s3 + $0x8] sm:$0xff] }
   0x9   :  { %v1371_v38 = vld [vmem:[%s1721_s3 + $0x20] sm:$0xff]  ;;  %v1383_v43 = vld [vmem:[%s1721_s3 + $0x28] sm:$0xff]  ;;  %s1212_s3 = smov 32  }
   0xa   :  { %177 = vmatpush1.bf16.msra.mxu0 %v1163_v3 }
   0xb   :  { %178 = vmatprep.subr.bf16.mxu0 %v1210_v0 }
   0xe   :  { %179 = vmatpush1.bf16.msra.mxu0 %v1164_v4 }
   0xf   :  { %180 = vmatprep.subr.bf16.mxu0 %v1210_v0 }
  0x12   :  { %181 = vmatpush1.bf16.msra.mxu0 %v1165_v6 }
  0x13   :  { %182 = vmatprep.subr.bf16.mxu0 %v1210_v0 }
  0x16   :  { %183 = vmatpush1.bf16.msra.mxu0 %v1166_v7 }
  0x17   :  { %184 = vmatprep.subr.bf16.mxu0 %v1210_v0 }
  0x1a   :  { %185 = vmatpush1.bf16.msra.mxu0 %v1167_v8 }
  0x1b   :  { %186 = vmatprep.subr.bf16.mxu0 %v1210_v0 }
  0x1e   :  { %187 = vmatpush1.bf16.msra.mxu0 %v1168_v9 }
  0x1f   :  { %196 = vmatprep.subr.bf16.mxu0 %v1210_v0 }
  0x22   :  { %197 = vmatpush2.bf16.msra.mxu0 %v1169_v10 }
  0x23   :  { %198 = vmatprep.subr.bf16.mxu0 %v1210_v0 }
  0x26   :  { %199 = vmatpush2.bf16.msra.mxu0 %v1170_v11 }
  0x27   :  { %200 = vmatprep.subr.bf16.mxu0 %v1210_v0 }
  0x2a   :  { %201 = vmatpush2.bf16.msra.mxu0 %v1171_v12 }
  0x2b   :  { %202 = vmatprep.subr.bf16.mxu0 %v1210_v0 }
  0x2e   :  { %203 = vmatpush2.bf16.msra.mxu0 %v1172_v13 }
  0x31   :  { %205 = vmatmul.mubr.bf16.vlgmr.msra.gmra.mxu0 %v1173_v14 }
  0x32   :  { %1053 = vmatprep.mubr.msk.bf16.mxu0 %vm162_vm0, %v1176_v15 }
  0x39   :  { %213 = vmatmul.mubr.bf16.gmra.mxu0 %v1178_v16 }
  0x3a   :  { %1054 = vmatprep.mubr.msk.bf16.mxu0 %vm162_vm0, %v1179_v17 }
  0x41   :  { %221 = vmatmul.mubr.bf16.gmra.mxu0 %v1181_v18 }
  0xf1   :  { %v1329_v20 = vpop.f32.mrf.mxu0 }
  0xf2   :  { %v235_v21 = vmul.f32 %v1327_v19, %v1329_v20 }
  0xf3   :  { %v208_v22 = vpop.f32.mrf.mxu0 }
  0xf4   :  { %241 = vrot.lane.b32.xlu0 %v235_v21, %s1211_s27  ;;  %v324_v24 = vmul.f32 %v235_v21, %v1329_v20 }
  0xf5   :  { %v1340_v25 = vpop.f32.mrf.mxu0 }
  0xf6   :  { %v236_v26 = vmul.f32 %v1336_v23, %v1340_v25  ;;  %330 = vrot.lane.b32.xlu1 %v324_v24, %s1211_s27 }
  0xf7   :  { %v211_v27 = vpop.f32.mrf.mxu0 }
  0xf8   :  { %243 = vrot.lane.b32.xlu0 %v236_v26, %s1211_s27  ;;  %v325_v30 = vmul.f32 %v236_v26, %v1340_v25 }
  0xf9   :  { %v1351_v29 = vpop.f32.mrf.mxu0 }
  0xfa   :  { %v237_v31 = vmul.f32 %v1348_v28, %v1351_v29 }
  0xfb   :  { %v216_v32 = vpop.f32.mrf.mxu0 }
  0xfc   :  { %332 = vrot.lane.b32.xlu0 %v325_v30, %s1211_s27  ;;  %245 = vrot.lane.b32.xlu1 %v237_v31, %s1211_s27  ;;  %v326_v35 = vmul.f32 %v237_v31, %v1351_v29 }
  0xfd   :  { %v1363_v34 = vpop.f32.mrf.mxu0 }
  0xfe   :  { %v238_v36 = vmul.f32 %v1359_v33, %v1363_v34 }
  0xff   :  { %v219_v37 = vpop.f32.mrf.mxu0 }
 0x100   :  { %334 = vrot.lane.b32.xlu0 %v326_v35, %s1211_s27  ;;  %247 = vrot.lane.b32.xlu1 %v238_v36, %s1211_s27  ;;  %v327_v40 = vmul.f32 %v238_v36, %v1363_v34 }
 0x101   :  { %v1375_v39 = vpop.f32.mrf.mxu0 }
 0x102   :  { %v239_v41 = vmul.f32 %v1371_v38, %v1375_v39 }
 0x103   :  { %v224_v42 = vpop.f32.mrf.mxu0 }
 0x104   :  { %336 = vrot.lane.b32.xlu0 %v327_v40, %s1211_s27  ;;  %249 = vrot.lane.b32.xlu1 %v239_v41, %s1211_s27  ;;  %v328_v45 = vmul.f32 %v239_v41, %v1375_v39 }
 0x105   :  { %v1387_v44 = vpop.f32.mrf.mxu0 }
 0x106   :  { %v240_v46 = vmul.f32 %v1383_v43, %v1387_v44 }
 0x107   :  { %v227_v47 = vpop.f32.mrf.mxu0 }
 0x108   :  { %338 = vrot.lane.b32.xlu0 %v328_v45, %s1211_s27  ;;  %251 = vrot.lane.b32.xlu1 %v240_v46, %s1211_s27  ;;  %v329_v48 = vmul.f32 %v240_v46, %v1387_v44 }
 0x10c   :  { %340 = vrot.lane.b32.xlu1 %v329_v48, %s1211_s27 }
 0x166   :  { %v242_v49 = vpop.permute.xlu0 %241 }
 0x167   :  { %v253_v50 = vadd.f32 %v242_v49, %v235_v21 }
 0x168   :  { %v331_v51 = vpop.permute.xlu1 %330 }
 0x169   :  { %v342_v52 = vadd.f32 %v331_v51, %v324_v24  ;;  %259 = vrot.lane.b32.xlu0 %v253_v50, %s1212_s3 }
 0x16a   :  { %v244_v53 = vpop.permute.xlu0 %243 }
 0x16b   :  { %348 = vrot.lane.b32.xlu1 %v342_v52, %s1212_s3  ;;  %v254_v54 = vadd.f32 %v244_v53, %v236_v26 }
 0x16e   :  { %v333_v55 = vpop.permute.xlu0 %332  ;;  %v246_v56 = vpop.permute.xlu1 %245 }
 0x16f   :  { %v343_v57 = vadd.f32 %v333_v55, %v325_v30  ;;  %261 = vrot.lane.b32.xlu1 %v254_v54, %s1212_s3  ;;  %v255_v60 = vadd.f32 %v246_v56, %v237_v31 }
 0x171   :  { %350 = vrot.lane.b32.xlu0 %v343_v57, %s1212_s3 }
 0x172   :  { %v335_v58 = vpop.permute.xlu0 %334  ;;  %v248_v59 = vpop.permute.xlu1 %247 }
 0x173   :  { %v256_v61 = vadd.f32 %v248_v59, %v238_v36  ;;  %v344_v0 = vadd.f32 %v335_v58, %v326_v35 }
 0x175   :  { %263 = vrot.lane.b32.xlu0 %v255_v60, %s1212_s3  ;;  %265 = vrot.lane.b32.xlu1 %v256_v61, %s1212_s3 }
 0x176   :  { %v337_v62 = vpop.permute.xlu0 %336  ;;  %v250_v63 = vpop.permute.xlu1 %249 }
 0x177   :  { %v257_v1 = vadd.f32 %v250_v63, %v239_v41  ;;  %v345_v3 = vadd.f32 %v337_v62, %v327_v40 }
 0x179   :  { %352 = vrot.lane.b32.xlu0 %v344_v0, %s1212_s3  ;;  %267 = vrot.lane.b32.xlu1 %v257_v1, %s1212_s3 }
 0x17a   :  { %v252_v2 = vpop.permute.xlu1 %251  ;;  %v339_v5 = vpop.permute.xlu0 %338 }
 0x17b   :  { %v258_v4 = vadd.f32 %v252_v2, %v240_v46  ;;  %v346_v7 = vadd.f32 %v339_v5, %v328_v45  ;;  %v1182_v5 = vld [vmem:[%s1722_s2 + $0x78] sm:$0xff]  }
 0x17c   :  { %1081 = vmatprep.subr.bf16.mxu1 %v1182_v5 }
 0x17d   :  { %354 = vrot.lane.b32.xlu0 %v345_v3, %s1212_s3  ;;  %269 = vrot.lane.b32.xlu1 %v258_v4, %s1212_s3 }
 0x17e   :  { %v341_v6 = vpop.permute.xlu1 %340 }
 0x17f   :  { %v347_v8 = vadd.f32 %v341_v6, %v329_v48  ;;  %v1183_v6 = vld [vmem:[%s1722_s2 + $0x38] sm:$0xff]  }
 0x180   :  { %1082 = vmatpush3.bf16.msra.mxu1 %v1183_v6 }
 0x181   :  { %356 = vrot.lane.b32.xlu0 %v346_v7, %s1212_s3  ;;  %358 = vrot.lane.b32.xlu1 %v347_v8, %s1212_s3 }
 0x1db   :  { %v260_v9 = vpop.permute.xlu0 %259 }
 0x1dc   :  { %v271_v10 = vadd.f32 %v260_v9, %v253_v50  ;;  %v1186_v9 = vld [vmem:[%s1722_s2 + $0x68] sm:$0xff]  }
 0x1dd   :  { %v349_v11 = vpop.permute.xlu1 %348 }
 0x1de   :  { %v360_v12 = vadd.f32 %v349_v11, %v342_v52  ;;  %277 = vrot.lane.b32.xlu0 %v271_v10, %s1213_s14  ;;  %v1188_v11 = vld [vmem:[%s1722_s2 + $0x60] sm:$0xff]  }
 0x1e0   :  { %366 = vrot.lane.b32.xlu1 %v360_v12, %s1213_s14 }
 0x1e1   :  { %v262_v13 = vpop.permute.xlu1 %261 }
 0x1e2   :  { %v272_v14 = vadd.f32 %v262_v13, %v254_v54  ;;  %v1190_v13 = vld [vmem:[%s1722_s2 + $0x58] sm:$0xff]  }
 0x1e3   :  { %v351_v15 = vpop.permute.xlu0 %350 }
 0x1e4   :  { %v361_v16 = vadd.f32 %v351_v15, %v343_v57  ;;  %279 = vrot.lane.b32.xlu1 %v272_v14, %s1213_s14  ;;  %v1192_v15 = vld [vmem:[%s1722_s2 + $0x50] sm:$0xff]  }
 0x1e6   :  { %368 = vrot.lane.b32.xlu0 %v361_v16, %s1213_s14 }
 0x1e7   :  { %v264_v17 = vpop.permute.xlu0 %263  ;;  %v266_v18 = vpop.permute.xlu1 %265 }
 0x1e8   :  { %v273_v21 = vadd.f32 %v264_v17, %v255_v60  ;;  %v274_v22 = vadd.f32 %v266_v18, %v256_v61  ;;  %v1194_v17 = vld [vmem:[%s1722_s2 + $0x48] sm:$0xff]  }
 0x1e9   :  { %v1195_v18 = vld [vmem:[%s1722_s2 + $0x8] sm:$0xff]  }
 0x1ea   :  { %281 = vrot.lane.b32.xlu0 %v273_v21, %s1213_s14  ;;  %283 = vrot.lane.b32.xlu1 %v274_v22, %s1213_s14 }
 0x1eb   :  { %v353_v24 = vpop.permute.xlu0 %352  ;;  %v268_v26 = vpop.permute.xlu1 %267 }
 0x1ec   :  { %v362_v27 = vadd.f32 %v353_v24, %v344_v0  ;;  %v275_v30 = vadd.f32 %v268_v26, %v257_v1  ;;  %v1215_v24 = vmov 0.0  }
 0x1ee   :  { %370 = vrot.lane.b32.xlu0 %v362_v27, %s1213_s14  ;;  %285 = vrot.lane.b32.xlu1 %v275_v30, %s1213_s14 }
 0x1ef   :  { %v355_v31 = vpop.permute.xlu0 %354  ;;  %v270_v32 = vpop.permute.xlu1 %269 }
 0x1f0   :  { %v363_v35 = vadd.f32 %v355_v31, %v345_v3  ;;  %v276_v36 = vadd.f32 %v270_v32, %v258_v4 }
 0x1f2   :  { %372 = vrot.lane.b32.xlu0 %v363_v35, %s1213_s14  ;;  %287 = vrot.lane.b32.xlu1 %v276_v36, %s1213_s14 }
 0x1f3   :  { %v357_v37 = vpop.permute.xlu0 %356  ;;  %v359_v40 = vpop.permute.xlu1 %358 }
 0x1f4   :  { %v364_v41 = vadd.f32 %v357_v37, %v346_v7  ;;  %v365_v42 = vadd.f32 %v359_v40, %v347_v8  ;;  %v1184_v7 = vld [vmem:[%s1722_s2 + $0x70] sm:$0xff]  }
 0x1f5   :  { %v1185_v8 = vld [vmem:[%s1722_s2 + $0x30] sm:$0xff]   ;;  %1083 = vmatprep.subr.bf16.mxu1 %v1184_v7 }
 0x1f6   :  { %374 = vrot.lane.b32.xlu0 %v364_v41, %s1213_s14  ;;  %376 = vrot.lane.b32.xlu1 %v365_v42, %s1213_s14 }
 0x1f7   :  { %1084 = vmatpush3.bf16.msra.mxu1 %v1185_v8 }
 0x1f8   :  { %1085 = vmatprep.subr.bf16.mxu1 %v1186_v9 }
 0x250   :  { %v278_v45 = vpop.permute.xlu0 %277 }
 0x251   :  { %v1420_v46 = vadd.f32 %v278_v45, %v271_v10  ;;  %v1187_v10 = vld [vmem:[%s1722_s2 + $0x28] sm:$0xff]  }
 0x252   :  { %v367_v47 = vpop.permute.xlu1 %366  ;;  %1086 = vmatpush3.bf16.msra.mxu1 %v1187_v10 }
 0x253   :  { %v1422_v48 = vadd.f32 %v367_v47, %v360_v12  ;;  %295 = vrot.lane.b32.xlu0 %v1420_v46, %s1214_s15  ;;  %v1189_v12 = vld [vmem:[%s1722_s2 + $0x20] sm:$0xff]   ;;  %1087 = vmatprep.subr.bf16.mxu1 %v1188_v11 }
 0x255   :  { %384 = vrot.lane.b32.xlu1 %v1422_v48, %s1214_s15 }
 0x256   :  { %v280_v49 = vpop.permute.xlu1 %279  ;;  %1088 = vmatpush3.bf16.msra.mxu1 %v1189_v12 }
 0x257   :  { %v1428_v50 = vadd.f32 %v280_v49, %v272_v14  ;;  %v1191_v14 = vld [vmem:[%s1722_s2 + $0x18] sm:$0xff]   ;;  %1089 = vmatprep.subr.bf16.mxu1 %v1190_v13 }
 0x258   :  { %v369_v51 = vpop.permute.xlu0 %368 }
 0x259   :  { %v1430_v52 = vadd.f32 %v369_v51, %v361_v16  ;;  %297 = vrot.lane.b32.xlu1 %v1428_v50, %s1214_s15  ;;  %v1193_v16 = vld [vmem:[%s1722_s2 + $0x10] sm:$0xff]  }
 0x25a   :  { %1090 = vmatpush3.bf16.msra.mxu1 %v1191_v14 }
 0x25b   :  { %386 = vrot.lane.b32.xlu0 %v1430_v52, %s1214_s15  ;;  %1091 = vmatprep.subr.bf16.mxu1 %v1192_v15 }
 0x25c   :  { %v282_v53 = vpop.permute.xlu0 %281  ;;  %v284_v54 = vpop.permute.xlu1 %283 }
 0x25d   :  { %v1436_v55 = vadd.f32 %v282_v53, %v273_v21  ;;  %v1438_v56 = vadd.f32 %v284_v54, %v274_v22  ;;  %v1196_v21 = vld [vmem:[%s1722_s2 + $0x40] sm:$0xff]  }
 0x25e   :  { %1092 = vmatpush3.bf16.msra.mxu1 %v1193_v16  ;;  %v1197_v22 = vld [vmem:[%s1722_s2] sm:$0xff]  }
 0x25f   :  { %299 = vrot.lane.b32.xlu0 %v1436_v55, %s1214_s15  ;;  %301 = vrot.lane.b32.xlu1 %v1438_v56, %s1214_s15 }
 0x260   :  { %v371_v57 = vpop.permute.xlu0 %370  ;;  %v286_v58 = vpop.permute.xlu1 %285  ;;  %1093 = vmatprep.subr.bf16.mxu1 %v1194_v17 }
 0x261   :  { %v1444_v59 = vadd.f32 %v371_v57, %v362_v27  ;;  %v1446_v60 = vadd.f32 %v286_v58, %v275_v30 }
 0x262   :  { %1094 = vmatpush3.bf16.msra.mxu1 %v1195_v18 }
 0x263   :  { %388 = vrot.lane.b32.xlu0 %v1444_v59, %s1214_s15  ;;  %303 = vrot.lane.b32.xlu1 %v1446_v60, %s1214_s15 }
 0x264   :  { %v373_v61 = vpop.permute.xlu0 %372  ;;  %v288_v62 = vpop.permute.xlu1 %287  ;;  %1095 = vmatprep.subr.bf16.mxu1 %v1196_v21 }
 0x265   :  { %v1452_v63 = vadd.f32 %v373_v61, %v363_v35  ;;  %v1454_v0 = vadd.f32 %v288_v62, %v276_v36 }
 0x266   :  { %1096 = vmatpush3.bf16.msra.mxu1 %v1197_v22 }
 0x267   :  { %390 = vrot.lane.b32.xlu0 %v1452_v63, %s1214_s15  ;;  %305 = vrot.lane.b32.xlu1 %v1454_v0, %s1214_s15 }
 0x268   :  { %v375_v1 = vpop.permute.xlu0 %374  ;;  %v377_v2 = vpop.permute.xlu1 %376  ;;  %1126 = vmatprep.subr.bf16.mxu1 %v1215_v24 }
 0x269   :  { %v1460_v3 = vadd.f32 %v375_v1, %v364_v41  ;;  %v1462_v4 = vadd.f32 %v377_v2, %v365_v42 }
 0x26b   :  { %392 = vrot.lane.b32.xlu0 %v1460_v3, %s1214_s15  ;;  %394 = vrot.lane.b32.xlu1 %v1462_v4, %s1214_s15 }
 0x2c5   :  { %v296_v27 = vpop.permute.xlu0 %295 }
 0x2c6   :  { %v307_v35 = vadd.f32 %v296_v27, %v1420_v46 }
 0x2c7   :  { %v385_v26 = vpop.permute.xlu1 %384 }
 0x2c8   :  { %v396_v57 = vadd.f32 %v385_v26, %v1422_v48 }
 0x2cb   :  { %v298_v30 = vpop.permute.xlu1 %297 }
 0x2cc   :  { %v308_v32 = vadd.f32 %v298_v30, %v1428_v50  ;;  %v426_v30 = vlaneseq }
 0x2cd   :  { %v387_v31 = vpop.permute.xlu0 %386 }
 0x2ce   :  { %v313_v40 = vadd.f32 %v308_v32, %v307_v35  ;;  %v397_v51 = vadd.f32 %v387_v31, %v1430_v52  ;;  %v418_v31 = vld [vmem:[%s1723_s5] sm:$0x1] }
 0x2d0   :  { %v402_v61 = vadd.f32 %v397_v51, %v396_v57 }
 0x2d1   :  { %v300_v36 = vpop.permute.xlu0 %299  ;;  %v302_v37 = vpop.permute.xlu1 %301 }
 0x2d2   :  { %v309_v41 = vadd.f32 %v300_v36, %v1436_v55  ;;  %v310_v45 = vadd.f32 %v302_v37, %v1438_v56  ;;  %v422_v37 = vld [vmem:[%s1724_s6] sm:$0x1] }
 0x2d4   :  { %v314_v42 = vadd.f32 %v313_v40, %v309_v41 }
 0x2d5   :  { %v389_v47 = vpop.permute.xlu0 %388  ;;  %v304_v49 = vpop.permute.xlu1 %303 }
 0x2d6   :  { %v315_v53 = vadd.f32 %v314_v42, %v310_v45  ;;  %v311_v54 = vadd.f32 %v304_v49, %v1446_v60  ;;  %v398_v50 = vadd.f32 %v389_v47, %v1444_v59 }
 0x2d8   :  { %v316_v62 = vadd.f32 %v315_v53, %v311_v54  ;;  %v403_v56 = vadd.f32 %v402_v61, %v398_v50 }
 0x2d9   :  { %v391_v46 = vpop.permute.xlu0 %390  ;;  %v306_v58 = vpop.permute.xlu1 %305 }
 0x2da   :  { %v399_v55 = vadd.f32 %v391_v46, %v1452_v63  ;;  %v312_v1 = vadd.f32 %v306_v58, %v1454_v0 }
 0x2dc   :  { %v317_v2 = vadd.f32 %v316_v62, %v312_v1  ;;  %v404_v52 = vadd.f32 %v403_v56, %v399_v55 }
 0x2dd   :  { %v393_v5 = vpop.permute.xlu0 %392  ;;  %v395_v6 = vpop.permute.xlu1 %394 }
 0x2de   :  { %v318_v7 = vrot.slane %v317_v2, 4  ;;  %v400_v60 = vadd.f32 %v393_v5, %v1460_v3  ;;  %v401_v59 = vadd.f32 %v395_v6, %v1462_v4  ;;  %v427_v4 = vshrl.u32 %v426_v30, 7  ;;  %v1203_v30 = vld [vmem:[%s1722_s2 + $0x90] sm:$0xff]  }
 0x2e0   :  { %v319_v8 = vadd.f32 %v318_v7, %v317_v2  ;;  %v405_v48 = vadd.f32 %v404_v52, %v400_v60  ;;  %v1532_v32 = vsub.s32 0, %v427_v4  ;;  %v1204_v4 = vld [vmem:[%s1722_s2 + $0x88] sm:$0xff]  }
 0x2e2   :  { %v320_v9 = vrot.slane %v319_v8, 2  ;;  %v406_v10 = vadd.f32 %v405_v48, %v401_v59 }
 0x2e4   :  { %v321_v11 = vadd.f32 %v320_v9, %v319_v8  ;;  %v407_v12 = vrot.slane %v406_v10, 4 }
 0x2e6   :  { %v322_v13 = vrot.slane %v321_v11, 1  ;;  %v408_v63 = vadd.f32 %v407_v12, %v406_v10 }
 0x2e8   :  { %v323_v14 = vadd.f32 %v322_v13, %v321_v11  ;;  %v409_v0 = vrot.slane %v408_v63, 2 }
 0x2ea   :  { %v410_v15 = vadd.f32 %v409_v0, %v408_v63  ;;  %v413_v16 = vmul.f32 0.001953125, %v323_v14 }
 0x2ec   :  { %v411_v17 = vrot.slane %v410_v15, 1  ;;  %v415_v21 = vmul.f32 %v413_v16, %v413_v16 }
 0x2ee   :  { %v412_v18 = vadd.f32 %v411_v17, %v410_v15  ;;  %v1199_v17 = vld [vmem:[%s1722_s2 + $0xb0] sm:$0xff]  }
 0x2f0   :  { %v414_v22 = vmul.f32 0.001953125, %v412_v18 }
 0x2f2   :  { %v416_v26 = vsub.f32 %v414_v22, %v415_v21 }
 0x2f4   :  { %v417_v3 = vmax.f32 %v416_v26, 0.0  ;;  %v1201_v26 = vld [vmem:[%s1722_s2 + $0xa0] sm:$0xff]  }
 0x2f6   :  { %v419_v27 = vadd.f32 1e-05, %v417_v3  ;;  %v1202_v3 = vld [vmem:[%s1722_s2 + $0x98] sm:$0xff]  }
 0x2f8   :  { %1206 = vrsqrt.f32 %v419_v27 }
 0x305   :  { %v1207_v35 = vpop.eup %1206 }
 0x306   :  { %v421_v36 = vmul.f32 %v1207_v35, %v418_v31 }
 0x308   :  { %v423_v40 = vmul.f32 %v421_v36, %v413_v16  ;;  %v429_v41 = vrot.slane %v421_v36, %v1532_v32 }
 0x30a   :  { %v424_v42 = vsub.f32 %v422_v37, %v423_v40  ;;  %v431_v45 = vmul.f32 %v429_v41, %v1329_v20  ;;  %v432_v49 = vmul.f32 %v429_v41, %v1340_v25  ;;  %v433_v51 = vmul.f32 %v429_v41, %v1351_v29  ;;  %v1205_v37 = vld [vmem:[%s1722_s2 + $0x80] sm:$0xff]  }
 0x30b   :  { %v434_v53 = vmul.f32 %v429_v41, %v1363_v34  ;;  %v435_v54 = vmul.f32 %v429_v41, %v1375_v39  ;;  %v436_v57 = vmul.f32 %v429_v41, %v1387_v44 }
 0x30c   :  { %v441_v47 = vrot.slane %v424_v42, %v1532_v32 }
 0x30e   :  { %v443_v50 = vadd.f32 %v441_v47, %v431_v45  ;;  %v444_v46 = vadd.f32 %v441_v47, %v432_v49  ;;  %v445_v58 = vadd.f32 %v441_v47, %v433_v51  ;;  %v446_v61 = vadd.f32 %v441_v47, %v434_v53 }
 0x30f   :  { %v447_v62 = vadd.f32 %v441_v47, %v435_v54  ;;  %v448_v55 = vadd.f32 %v441_v47, %v436_v57 }
 0x310   :  { %vm449_vm1 = vcmp.gt.f32.partialorder %v443_v50, 0.0  ;;  %vm450_vm2 = vcmp.gt.f32.partialorder %v444_v46, 0.0  ;;  %vm451_vm3 = vcmp.gt.f32.partialorder %v445_v58, 0.0  ;;  %v455_v20 = vmul.f32 0.01, %v443_v50 }
 0x311   :  { %v456_v1 = vmul.f32 0.01, %v444_v46  ;;  %v457_v25 = vmul.f32 0.01, %v445_v58  ;;  %vm452_vm4 = vcmp.gt.f32.partialorder %v446_v61, 0.0  ;;  %vm453_vm5 = vcmp.gt.f32.partialorder %v447_v62, 0.0 }
 0x312   :  { %v461_v29 = vsel %vm449_vm1, %v443_v50, %v455_v20  ;;  %v458_v34 = vmul.f32 0.01, %v446_v61  ;;  %v459_v39 = vmul.f32 0.01, %v447_v62  ;;  %v460_v5 = vmul.f32 0.01, %v448_v55 }
 0x313   :  { %v462_v56 = vsel %vm450_vm2, %v444_v46, %v456_v1  ;;  %v463_v44 = vsel %vm451_vm3, %v445_v58, %v457_v25  ;;  %v1546_v2 = vmul.f32 %v461_v29, %v1327_v19  ;;  %vm454_vm7 = vcmp.gt.f32.partialorder %v448_v55, 0.0 }
 0x314   :  { %v1549_v6 = vmul.f32 %v462_v56, %v1336_v23  ;;  %v1552_v52 = vmul.f32 %v463_v44, %v1348_v28  ;;  %v464_v7 = vsel %vm452_vm4, %v446_v61, %v458_v34  ;;  %v465_v60 = vsel %vm453_vm5, %v447_v62, %v459_v39 }
 0x315   :  { %v480_v8 = vrot.slane %v1546_v2, 1  ;;  %v1556_v48 = vmul.f32 %v464_v7, %v1359_v33  ;;  %v1559_v59 = vmul.f32 %v465_v60, %v1371_v38  ;;  %v466_v12 = vsel %vm454_vm7, %v448_v55, %v460_v5  ;;  %v1198_v33 = vld [vmem:[%s1722_s2 + $0xb8] sm:$0xff]  }
 0x316   :  { %v481_v19 = vrot.slane %v1549_v6, 1  ;;  %v483_v9 = vrot.slane %v1552_v52, 1  ;;  %v472_v14 = vmul.f32 %v466_v12, %v1383_v43  ;;  %v513_v0 = vpack.c.bf16 %v1549_v6, %v1546_v2  ;;  %v1200_v43 = vld [vmem:[%s1722_s2 + $0xa8] sm:$0xff]   ;;  %v828_v12 = vld [vmem:[%s1725_s4 + $0x10] sm:$0xff] }
 0x317   :  { %v485_v23 = vrot.slane %v1556_v48, 1  ;;  %v487_v28 = vrot.slane %v1559_v59, 1  ;;  %v516_v21 = vpack.c.bf16 %v1556_v48, %v1552_v52  ;;  %v519_v27 = vpack.c.bf16 %v1559_v59, %v1559_v59 }
 0x318   :  { %v482_v10 = vsel %vm479_vm6, %v480_v8, %v481_v19  ;;  %v484_v11 = vsel %vm479_vm6, %v481_v19, %v483_v9  ;;  %v489_v16 = vrot.slane %v472_v14, 1  ;;  %v497_v31 = vrot.slane %v1546_v2, 2  ;;  %v827_v8 = vld [vmem:[%s1725_s4 + $0x8] sm:$0xff] }
 0x319   :  { %v514_v13 = vpack.c.bf16 %v484_v11, %v482_v10  ;;  %v486_v38 = vsel %vm479_vm6, %v483_v9, %v485_v23  ;;  %v488_v63 = vsel %vm479_vm6, %v485_v23, %v487_v28  ;;  %v498_v35 = vrot.slane %v1549_v6, 2 }
 0x31a   :  { %v517_v15 = vpack.c.bf16 %v488_v63, %v486_v38  ;;  %v490_v18 = vsel %vm479_vm6, %v487_v28, %v489_v16  ;;  %v500_v36 = vrot.slane %v1552_v52, 2  ;;  %v502_v45 = vrot.slane %v1556_v48, 2  ;;  %v829_v63 = vld [vmem:[%s1725_s4 + $0x18] sm:$0xff] }
 0x31b   :  { %746 = vmatprep.mubr.bf16.mxu1 %v514_v13  ;;  %v520_v22 = vpack.c.bf16 %v490_v18, %v490_v18  ;;  %v499_v40 = vsel %vm496_vm9, %v497_v31, %v498_v35  ;;  %v504_v47 = vrot.slane %v1559_v59, 2  ;;  %v506_v54 = vrot.slane %v472_v14, 2 }
 0x31c   :  { %747 = vmatmul.mubr.bf16.vlgmr.msra.gmra.mxu1 %v513_v0  ;;  %v501_v41 = vsel %vm496_vm9, %v498_v35, %v500_v36  ;;  %v503_v49 = vsel %vm496_vm9, %v500_v36, %v502_v45 }
 0x31d   :  { %1127 = vmatpush3.bf16.msra.mxu1 %v1198_v33  ;;  %754 = vmatprep.mubr.bf16.mxu1 %v517_v15  ;;  %v515_v42 = vpack.c.bf16 %v501_v41, %v499_v40  ;;  %v505_v51 = vsel %vm496_vm9, %v502_v45, %v504_v47  ;;  %v507_v57 = vsel %vm496_vm9, %v504_v47, %v506_v54 }
 0x31e   :  { %1128 = vmatprep.subr.bf16.mxu1 %v1215_v24  ;;  %v518_v53 = vpack.c.bf16 %v505_v51, %v503_v49  ;;  %v521_v50 = vpack.c.bf16 %v507_v57, %v507_v57 }
 0x321   :  { %1129 = vmatpush3.bf16.msra.mxu1 %v1199_v17 }
 0x322   :  { %1130 = vmatprep.subr.bf16.mxu1 %v1215_v24 }
 0x324   :  { %755 = vmatmul.mubr.bf16.gmra.mxu1 %v516_v21 }
 0x325   :  { %1131 = vmatpush3.bf16.msra.mxu1 %v1200_v43  ;;  %762 = vmatprep.mubr.bf16.mxu1 %v520_v22  ;;  %v830_v43 = vld [vmem:[%s1725_s4 + $0x20] sm:$0xff] }
 0x326   :  { %1132 = vmatprep.subr.bf16.mxu1 %v1215_v24 }
 0x329   :  { %1133 = vmatpush3.bf16.msra.mxu1 %v1201_v26 }
 0x32a   :  { %1134 = vmatprep.subr.bf16.mxu1 %v1215_v24 }
 0x32c   :  { %763 = vmatmul.mubr.bf16.gmra.mxu1 %v519_v27 }
 0x32d   :  { %1135 = vmatpush3.bf16.msra.mxu1 %v1202_v3  ;;  %1142 = vmatprep.mubr.msk.bf16.mxu1 %vm1216_vm8, %v1215_v24 }
 0x32e   :  { %1136 = vmatprep.subr.bf16.mxu1 %v1215_v24 }
 0x331   :  { %1137 = vmatpush3.bf16.msra.mxu1 %v1203_v30 }
 0x332   :  { %1138 = vmatprep.subr.bf16.mxu1 %v1215_v24 }
 0x335   :  { %1139 = vmatpush3.bf16.msra.mxu1 %v1204_v4 }
 0x336   :  { %1140 = vmatprep.subr.bf16.mxu1 %v1215_v24 }
 0x339   :  { %1141 = vmatpush3.bf16.msra.mxu1 %v1205_v37 }
 0x33c   :  { %1143 = vmatmul.mubr.bf16.vlgmr.msra.gmra.mxu1 %v515_v42 }
 0x33d   :  { %1146 = vmatprep.mubr.msk.bf16.mxu1 %vm1216_vm8, %v1215_v24 }
 0x344   :  { %1147 = vmatmul.mubr.bf16.gmra.mxu1 %v518_v53 }
 0x345   :  { %1150 = vmatprep.mubr.msk.bf16.mxu1 %vm1216_vm8, %v1215_v24  ;;  %v826_v24 = vld [vmem:[%s1725_s4] sm:$0xff] }
 0x34c   :  { %1151 = vmatmul.mubr.bf16.gmra.mxu1 %v521_v50 }
 0x3dc   :  { %v1097_v46 = vpop.f32.mrf.mxu1 }
 0x3de   :  { %v1098_v58 = vpop.f32.mrf.mxu1 }
 0x3df   :  { %v1099_v44 = vadd.f32 %v1098_v58, %v1097_v46 }
 0x3e0   :  { %v1100_v61 = vpop.f32.mrf.mxu1 }
 0x3e2   :  { %v1101_v62 = vpop.f32.mrf.mxu1 }
 0x3e3   :  { %v1102_v52 = vadd.f32 %v1101_v62, %v1100_v61 }
 0x3e4   :  { %v1103_v55 = vpop.f32.mrf.mxu1 }
 0x3e6   :  { %v1104_v20 = vpop.f32.mrf.mxu1 }
 0x3e7   :  { %v1105_v9 = vadd.f32 %v1104_v20, %v1103_v55 }
 0x3e8   :  { %v1106_v1 = vpop.f32.mrf.mxu1 }
 0x3ea   :  { %v1107_v25 = vpop.f32.mrf.mxu1 }
 0x3eb   :  { %v1108_v33 = vadd.f32 %v1107_v25, %v1106_v1 }
 0x3ec   :  { %v1109_v29 = vpop.f32.mrf.mxu1 }
 0x3ee   :  { %v1110_v34 = vpop.f32.mrf.mxu1 }
 0x3ef   :  { %v1111_v16 = vadd.f32 %v1110_v34, %v1109_v29 }
 0x3f0   :  { %v1112_v39 = vpop.f32.mrf.mxu1 }
 0x3f2   :  { %v1113_v56 = vpop.f32.mrf.mxu1 }
 0x3fc   :  { %v804_v2 = vpop.f32.mrf.mxu1 }
 0x3fd   :  { %v1627_v5 = vadd.f32 %v1099_v44, %v804_v2 }
 0x3fe   :  { %v1144_v6 = vpop.f32.mrf.mxu1 }
 0x3ff   :  { %v831_v7 = vmul.f32 %v826_v24, %v1627_v5 }
 0x400   :  { %v807_v60 = vpop.f32.mrf.mxu1 }
 0x401   :  { %v1633_v48 = vadd.f32 %v1102_v52, %v807_v60  ;;  %836 = vrot.lane.b32.xlu0 %v831_v7, %s1211_s27  ;;  %v906_v59 = vmul.f32 %v831_v7, %v1627_v5 }
 0x402   :  { %v1145_v19 = vpop.f32.mrf.mxu1 }
 0x403   :  { %v832_v23 = vmul.f32 %v827_v8, %v1633_v48  ;;  %911 = vrot.lane.b32.xlu1 %v906_v59, %s1211_s27 }
 0x404   :  { %v812_v28 = vpop.f32.mrf.mxu1 }
 0x405   :  { %v813_v10 = vadd.f32 %v1105_v9, %v812_v28  ;;  %v907_v11 = vmul.f32 %v832_v23, %v1633_v48 }
 0x406   :  { %v1148_v13 = vpop.f32.mrf.mxu1 }
 0x407   :  { %913 = vrot.lane.b32.xlu0 %v907_v11, %s1211_s27  ;;  %838 = vrot.lane.b32.xlu1 %v832_v23, %s1211_s27  ;;  %v833_v14 = vmul.f32 %v828_v12, %v813_v10 }
 0x408   :  { %v815_v38 = vpop.f32.mrf.mxu1 }
 0x409   :  { %v1648_v0 = vadd.f32 %v1108_v33, %v815_v38  ;;  %v908_v21 = vmul.f32 %v833_v14, %v813_v10 }
 0x40a   :  { %v1149_v15 = vpop.f32.mrf.mxu1 }
 0x40b   :  { %840 = vrot.lane.b32.xlu0 %v833_v14, %s1211_s27  ;;  %v834_v17 = vmul.f32 %v829_v63, %v1648_v0 }
 0x40c   :  { %v820_v18 = vpop.f32.mrf.mxu1 }
 0x40d   :  { %v1655_v22 = vadd.f32 %v1111_v16, %v820_v18  ;;  %842 = vrot.lane.b32.xlu1 %v834_v17, %s1211_s27  ;;  %v909_v30 = vmul.f32 %v834_v17, %v1648_v0 }
 0x40e   :  { %v1152_v26 = vpop.f32.mrf.mxu1 }
 0x40f   :  { %915 = vrot.lane.b32.xlu0 %v908_v21, %s1211_s27  ;;  %v835_v3 = vmul.f32 %v830_v43, %v1655_v22 }
 0x410   :  { %v823_v27 = vpop.f32.mrf.mxu1 }
 0x411   :  { %844 = vrot.lane.b32.xlu1 %v835_v3, %s1211_s27  ;;  %v910_v31 = vmul.f32 %v835_v3, %v1655_v22 }
 0x412   :  { %v1153_v4 = vpop.f32.mrf.mxu1 }
 0x413   :  { %917 = vrot.lane.b32.xlu0 %v909_v30, %s1211_s27 }
 0x415   :  { %919 = vrot.lane.b32.xlu1 %v910_v31, %s1211_s27 }
 0x473   :  { %v837_v35 = vpop.permute.xlu0 %836 }
 0x474   :  { %v846_v36 = vadd.f32 %v837_v35, %v831_v7 }
 0x475   :  { %v912_v37 = vpop.permute.xlu1 %911 }
 0x476   :  { %v921_v40 = vadd.f32 %v912_v37, %v906_v59  ;;  %851 = vrot.lane.b32.xlu0 %v846_v36, %s1212_s3 }
 0x478   :  { %926 = vrot.lane.b32.xlu1 %v921_v40, %s1212_s3 }
 0x479   :  { %v914_v41 = vpop.permute.xlu0 %913  ;;  %v839_v42 = vpop.permute.xlu1 %838 }
 0x47a   :  { %v922_v45 = vadd.f32 %v914_v41, %v907_v11  ;;  %v847_v47 = vadd.f32 %v839_v42, %v832_v23 }
 0x47c   :  { %928 = vrot.lane.b32.xlu0 %v922_v45, %s1212_s3  ;;  %853 = vrot.lane.b32.xlu1 %v847_v47, %s1212_s3 }
 0x47d   :  { %v841_v49 = vpop.permute.xlu0 %840 }
 0x47e   :  { %v848_v51 = vadd.f32 %v841_v49, %v833_v14 }
 0x47f   :  { %v843_v53 = vpop.permute.xlu1 %842 }
 0x480   :  { %v849_v54 = vadd.f32 %v843_v53, %v834_v17  ;;  %855 = vrot.lane.b32.xlu0 %v848_v51, %s1212_s3 }
 0x481   :  { %v916_v57 = vpop.permute.xlu0 %915 }
 0x482   :  { %v923_v50 = vadd.f32 %v916_v57, %v908_v21  ;;  %857 = vrot.lane.b32.xlu1 %v849_v54, %s1212_s3 }
 0x483   :  { %v845_v46 = vpop.permute.xlu1 %844 }
 0x484   :  { %v850_v58 = vadd.f32 %v845_v46, %v835_v3  ;;  %930 = vrot.lane.b32.xlu0 %v923_v50, %s1212_s3 }
 0x485   :  { %v918_v61 = vpop.permute.xlu0 %917 }
 0x486   :  { %v924_v62 = vadd.f32 %v918_v61, %v909_v30  ;;  %859 = vrot.lane.b32.xlu1 %v850_v58, %s1212_s3 }
 0x487   :  { %v920_v55 = vpop.permute.xlu1 %919 }
 0x488   :  { %v925_v20 = vadd.f32 %v920_v55, %v910_v31  ;;  %932 = vrot.lane.b32.xlu0 %v924_v62, %s1212_s3 }
 0x48a   :  { %934 = vrot.lane.b32.xlu1 %v925_v20, %s1212_s3 }
 0x4e8   :  { %v852_v1 = vpop.permute.xlu0 %851 }
 0x4e9   :  { %v861_v25 = vadd.f32 %v852_v1, %v846_v36 }
 0x4ea   :  { %v927_v29 = vpop.permute.xlu1 %926 }
 0x4eb   :  { %v936_v34 = vadd.f32 %v927_v29, %v921_v40  ;;  %866 = vrot.lane.b32.xlu0 %v861_v25, %s1213_s14 }
 0x4ed   :  { %941 = vrot.lane.b32.xlu1 %v936_v34, %s1213_s14 }
 0x4ee   :  { %v929_v39 = vpop.permute.xlu0 %928  ;;  %v854_v56 = vpop.permute.xlu1 %853 }
 0x4ef   :  { %v937_v44 = vadd.f32 %v929_v39, %v922_v45  ;;  %v862_v2 = vadd.f32 %v854_v56, %v847_v47 }
 0x4f1   :  { %943 = vrot.lane.b32.xlu0 %v937_v44, %s1213_s14  ;;  %868 = vrot.lane.b32.xlu1 %v862_v2, %s1213_s14 }
 0x4f2   :  { %v856_v24 = vpop.permute.xlu0 %855 }
 0x4f3   :  { %v863_v6 = vadd.f32 %v856_v24, %v848_v51 }
 0x4f4   :  { %v858_v52 = vpop.permute.xlu1 %857 }
 0x4f5   :  { %v864_v7 = vadd.f32 %v858_v52, %v849_v54  ;;  %870 = vrot.lane.b32.xlu0 %v863_v6, %s1213_s14 }
 0x4f6   :  { %v931_v60 = vpop.permute.xlu0 %930 }
 0x4f7   :  { %v938_v8 = vadd.f32 %v931_v60, %v923_v50  ;;  %872 = vrot.lane.b32.xlu1 %v864_v7, %s1213_s14 }
 0x4f8   :  { %v860_v59 = vpop.permute.xlu1 %859 }
 0x4f9   :  { %v865_v19 = vadd.f32 %v860_v59, %v850_v58  ;;  %945 = vrot.lane.b32.xlu0 %v938_v8, %s1213_s14 }
 0x4fa   :  { %v933_v9 = vpop.permute.xlu0 %932 }
 0x4fb   :  { %v939_v23 = vadd.f32 %v933_v9, %v924_v62  ;;  %874 = vrot.lane.b32.xlu1 %v865_v19, %s1213_s14 }
 0x4fc   :  { %v935_v28 = vpop.permute.xlu1 %934 }
 0x4fd   :  { %v940_v10 = vadd.f32 %v935_v28, %v925_v20  ;;  %947 = vrot.lane.b32.xlu0 %v939_v23, %s1213_s14 }
 0x4ff   :  { %949 = vrot.lane.b32.xlu1 %v940_v10, %s1213_s14 }
 0x55d   :  { %v867_v11 = vpop.permute.xlu0 %866 }
 0x55e   :  { %v876_v12 = vadd.f32 %v867_v11, %v861_v25 }
 0x55f   :  { %v942_v13 = vpop.permute.xlu1 %941 }
 0x560   :  { %v951_v33 = vadd.f32 %v942_v13, %v936_v34  ;;  %881 = vrot.lane.b32.xlu0 %v876_v12, %s1214_s15 }
 0x562   :  { %956 = vrot.lane.b32.xlu1 %v951_v33, %s1214_s15 }
 0x563   :  { %v944_v38 = vpop.permute.xlu0 %943  ;;  %v869_v63 = vpop.permute.xlu1 %868 }
 0x564   :  { %v952_v14 = vadd.f32 %v944_v38, %v937_v44  ;;  %v877_v15 = vadd.f32 %v869_v63, %v862_v2 }
 0x566   :  { %958 = vrot.lane.b32.xlu0 %v952_v14, %s1214_s15  ;;  %883 = vrot.lane.b32.xlu1 %v877_v15, %s1214_s15 }
 0x567   :  { %v871_v16 = vpop.permute.xlu0 %870 }
 0x568   :  { %v878_v17 = vadd.f32 %v871_v16, %v863_v6 }
 0x569   :  { %v873_v18 = vpop.permute.xlu1 %872 }
 0x56a   :  { %v879_v43 = vadd.f32 %v873_v18, %v864_v7  ;;  %885 = vrot.lane.b32.xlu0 %v878_v17, %s1214_s15  ;;  %v990_v18 = vld [vmem:[%s1727_s8] sm:$0x1] }
 0x56b   :  { %v946_v21 = vpop.permute.xlu0 %945 }
 0x56c   :  { %v953_v26 = vadd.f32 %v946_v21, %v938_v8  ;;  %887 = vrot.lane.b32.xlu1 %v879_v43, %s1214_s15 }
 0x56d   :  { %v875_v3 = vpop.permute.xlu1 %874 }
 0x56e   :  { %v880_v27 = vadd.f32 %v875_v3, %v865_v19  ;;  %960 = vrot.lane.b32.xlu0 %v953_v26, %s1214_s15 }
 0x56f   :  { %v948_v30 = vpop.permute.xlu0 %947 }
 0x570   :  { %v954_v4 = vadd.f32 %v948_v30, %v939_v23  ;;  %889 = vrot.lane.b32.xlu1 %v880_v27, %s1214_s15 }
 0x571   :  { %v950_v31 = vpop.permute.xlu1 %949 }
 0x572   :  { %v955_v35 = vadd.f32 %v950_v31, %v940_v10  ;;  %962 = vrot.lane.b32.xlu0 %v954_v4, %s1214_s15 }
 0x574   :  { %964 = vrot.lane.b32.xlu1 %v955_v35, %s1214_s15 }
 0x5d2   :  { %v882_v36 = vpop.permute.xlu0 %881 }
 0x5d3   :  { %v891_v45 = vadd.f32 %v882_v36, %v876_v12 }
 0x5d4   :  { %v957_v37 = vpop.permute.xlu1 %956 }
 0x5d5   :  { %v966_v58 = vadd.f32 %v957_v37, %v951_v33 }
 0x5d8   :  { %v959_v40 = vpop.permute.xlu0 %958  ;;  %v884_v41 = vpop.permute.xlu1 %883 }
 0x5d9   :  { %v892_v42 = vadd.f32 %v884_v41, %v877_v15  ;;  %v967_v54 = vadd.f32 %v959_v40, %v952_v14  ;;  %v986_v15 = vld [vmem:[%s1726_s7] sm:$0x1] }
 0x5db   :  { %v896_v49 = vadd.f32 %v892_v42, %v891_v45  ;;  %v971_v55 = vadd.f32 %v967_v54, %v966_v58 }
 0x5dc   :  { %v886_v47 = vpop.permute.xlu0 %885 }
 0x5dd   :  { %v893_v51 = vadd.f32 %v886_v47, %v878_v17 }
 0x5de   :  { %v888_v53 = vpop.permute.xlu1 %887 }
 0x5df   :  { %v897_v57 = vadd.f32 %v896_v49, %v893_v51  ;;  %v894_v50 = vadd.f32 %v888_v53, %v879_v43 }
 0x5e0   :  { %v961_v46 = vpop.permute.xlu0 %960 }
 0x5e1   :  { %v968_v61 = vadd.f32 %v961_v46, %v953_v26  ;;  %v898_v20 = vadd.f32 %v897_v57, %v894_v50 }
 0x5e2   :  { %v890_v62 = vpop.permute.xlu1 %889 }
 0x5e3   :  { %v895_v1 = vadd.f32 %v890_v62, %v880_v27  ;;  %v972_v29 = vadd.f32 %v971_v55, %v968_v61 }
 0x5e4   :  { %v963_v25 = vpop.permute.xlu0 %962 }
 0x5e5   :  { %v899_v34 = vadd.f32 %v898_v20, %v895_v1  ;;  %v969_v39 = vadd.f32 %v963_v25, %v954_v4 }
 0x5e6   :  { %v965_v56 = vpop.permute.xlu1 %964 }
 0x5e7   :  { %v900_v44 = vrot.slane %v899_v34, 4  ;;  %v973_v2 = vadd.f32 %v972_v29, %v969_v39  ;;  %v970_v24 = vadd.f32 %v965_v56, %v955_v35 }
 0x5e9   :  { %v901_v6 = vadd.f32 %v900_v44, %v899_v34  ;;  %v974_v52 = vadd.f32 %v973_v2, %v970_v24 }
 0x5eb   :  { %v902_v7 = vrot.slane %v901_v6, 2  ;;  %v975_v60 = vrot.slane %v974_v52, 4 }
 0x5ed   :  { %v903_v8 = vadd.f32 %v902_v7, %v901_v6  ;;  %v976_v59 = vadd.f32 %v975_v60, %v974_v52 }
 0x5ef   :  { %v904_v19 = vrot.slane %v903_v8, 1  ;;  %v977_v9 = vrot.slane %v976_v59, 2 }
 0x5f1   :  { %v905_v23 = vadd.f32 %v904_v19, %v903_v8  ;;  %v978_v28 = vadd.f32 %v977_v9, %v976_v59 }
 0x5f3   :  { %v981_v10 = vmul.f32 0.001953125, %v905_v23  ;;  %v979_v11 = vrot.slane %v978_v28, 1 }
 0x5f5   :  { %v980_v12 = vadd.f32 %v979_v11, %v978_v28  ;;  %v983_v13 = vmul.f32 %v981_v10, %v981_v10 }
 0x5f7   :  { %v982_v33 = vmul.f32 0.001953125, %v980_v12 }
 0x5f9   :  { %v984_v38 = vsub.f32 %v982_v33, %v983_v13 }
 0x5fb   :  { %v985_v63 = vmax.f32 %v984_v38, 0.0 }
 0x5fd   :  { %v987_v14 = vadd.f32 1e-05, %v985_v63 }
 0x5ff   :  { %1208 = vrsqrt.f32 %v987_v14 }
 0x60c   :  { %v1209_v16 = vpop.eup %1208 }
 0x60d   :  { %v989_v17 = vmul.f32 %v1209_v16, %v986_v15 }
 0x60f   :  { %v991_v43 = vmul.f32 %v989_v17, %v981_v10  ;;  %v997_v21 = vrot.slane %v989_v17, %v1532_v32 }
 0x611   :  { %v992_v26 = vsub.f32 %v990_v18, %v991_v43  ;;  %v999_v3 = vmul.f32 %v997_v21, %v1627_v5  ;;  %v1000_v27 = vmul.f32 %v997_v21, %v1633_v48  ;;  %v1001_v30 = vmul.f32 %v997_v21, %v1648_v0 }
 0x612   :  { %v1002_v4 = vmul.f32 %v997_v21, %v1655_v22 }
 0x613   :  { %v1007_v31 = vrot.slane %v992_v26, %v1532_v32 }
 0x615   :  { %v1009_v35 = vadd.f32 %v1007_v31, %v999_v3  ;;  %v1010_v36 = vadd.f32 %v1007_v31, %v1000_v27  ;;  %v1011_v37 = vadd.f32 %v1007_v31, %v1001_v30  ;;  %v1012_v40 = vadd.f32 %v1007_v31, %v1002_v4 }
 0x617   :  { %vm1013_vm10 = vcmp.gt.f32.partialorder %v1009_v35, 0.0  ;;  %vm1014_vm11 = vcmp.gt.f32.partialorder %v1010_v36, 0.0  ;;  %vm1015_vm12 = vcmp.gt.f32.partialorder %v1011_v37, 0.0  ;;  %vm1016_vm13 = vcmp.gt.f32.partialorder %v1012_v40, 0.0 }
 0x618   :  { %v1017_v41 = vmul.f32 0.01, %v1009_v35  ;;  %v1018_v42 = vmul.f32 0.01, %v1010_v36  ;;  %v1019_v45 = vmul.f32 0.01, %v1011_v37 }
 0x619   :  { %v1020_v5 = vmul.f32 0.01, %v1012_v40 }
 0x61a   :  { %v1021_v47 = vsel %vm1013_vm10, %v1009_v35, %v1017_v41  ;;  %v1022_v48 = vsel %vm1014_vm11, %v1010_v36, %v1018_v42  ;;  %v1023_v49 = vsel %vm1015_vm12, %v1011_v37, %v1019_v45 }
 0x61b   :  { %v1024_v0 = vsel %vm1016_vm13, %v1012_v40, %v1020_v5  ;;  %1025 = vst [vmem:[%s1728_s9] sm:$0xff] %v1021_v47  ;;  %1026 = vst [vmem:[%s1728_s9 + $0x8] sm:$0xff] %v1022_v48 }
 0x61c   :  { %1079 = vst [vmem:[%s1728_s9 + $0x10] sm:$0xff] %v1023_v49  ;;  %1080 = vst [vmem:[%s1728_s9 + $0x18] sm:$0xff] %v1024_v0 }

</bundles_post_ra>
